<compile_context>
chip_gen: v6e
topology: v6e:2x2x1
jax: 0.10.0
libtpu: 0.0.40
codegen_flags: <defaults>
</compile_context>

<pallas_src>
import jax
import jax.numpy as jnp
from jax.experimental import pallas as pl
from jax.experimental.pallas import tpu as pltpu

_FEATURES = 64
_LANES = 128
_SUBLANES = 8
_INNER_ROWS = 1024            # rows per in-kernel chunk (multiple of 128)
_ROWS_PER_TILE = 16384        # rows streamed per grid step (multiple of _INNER_ROWS)
_MIN_SPLIT_ROWS = 4096        # split a 1-step grid in two once B >= 2 * this (megacore)
_MIN_ROWS_FOR_KERNEL = 8192   # below this the fused XLA matmul wins


def _round_up(x, m):
    return ((x + m - 1) // m) * m


def _linear_kernel(x_ref, w_ref, b_ref, o_ref):
    """One grid step: y[r] = sum_k x[r, k] * w[k] + b over a [tile_rows, 64] slab.

    x_ref: [tile_rows, 64] VMEM   (trailing dim 64 == full feature dim)
    w_ref: [8, 64]         VMEM   (weight row replicated over 8 sublanes)
    b_ref: [1]             SMEM   (bias scalar)
    o_ref: [1, tile_rows]  VMEM   (lane-dense output slab)
    """
    w8 = w_ref[...]                       # [8, 64], all rows identical
    bias = b_ref[0]
    n_inner = o_ref.shape[1] // _INNER_ROWS   # static Python int

    def body(c, carry):
        r0 = pl.multiple_of(c * _INNER_ROWS, _INNER_ROWS)
        xs = x_ref[pl.ds(r0, _INNER_ROWS), :]                  # [_INNER_ROWS, 64]
        # MXU NT contraction: [8, 64] x [_INNER_ROWS, 64]^T -> [8, _INNER_ROWS].
        y = jax.lax.dot_general(
            w8, xs,
            dimension_numbers=(((1,), (1,)), ((), ())),
            preferred_element_type=jnp.float32,
        )
        # All 8 rows are identical; keep row 0 -> lane-dense [1, _INNER_ROWS].
        o_ref[:, pl.ds(r0, _INNER_ROWS)] = (y[0:1, :] + bias).astype(o_ref.dtype)
        return carry

    jax.lax.fori_loop(0, n_inner, body, None)


def belief_model_forward(x, w, b, *, rows_per_tile=_ROWS_PER_TILE,
                         min_rows_for_kernel=_MIN_ROWS_FOR_KERNEL):
    """torch.nn.Linear(64, 1): x [B, 64] f32, w [64, 1] f32, b [1] f32 -> [B, 1] f32."""
    B, D = x.shape
    assert D == _FEATURES and w.shape == (D, 1) and b.shape == (1,)

    # Tiny batches (the module's typical usage, e.g. B=8): a fused XLA matmul
    # beats any custom call; the Pallas path pays off once it is HBM-bound.
    if B < max(min_rows_for_kernel, 1):
        return x @ w + b

    # --- tile selection ------------------------------------------------------
    tile_rows = max(_INNER_ROWS, min(_round_up(rows_per_tile, _INNER_ROWS),
                                     _round_up(B, _INNER_ROWS)))
    n_tiles = pl.cdiv(B, tile_rows)
    # Give v7x's two TensorCores at least two "parallel" grid steps.
    if n_tiles == 1 and B >= 2 * _MIN_SPLIT_ROWS:
        tile_rows = _round_up(pl.cdiv(B, 2), _INNER_ROWS)
        n_tiles = pl.cdiv(B, tile_rows)
    assert tile_rows % _INNER_ROWS == 0
    # With n_tiles == cdiv(B, tile_rows), any ragged garbage rows live only in
    # the tail of the LAST tile, so a flat [:B] slice recovers the result.

    # --- explicit scoped-VMEM budget (x block lane-padded 64 -> 128) ----------
    x_buf = tile_rows * _LANES * 4            # per double-buffered x block
    o_buf = _SUBLANES * tile_rows * 4         # [1, tile_rows] sublane-padded to 8
    vmem_limit = int(2 * (x_buf + o_buf) + (4 << 20))

    w8 = jnp.tile(w.reshape(1, D), (_SUBLANES, 1))   # [8, 64]; avoids an M=1 matmul

    out = pl.pallas_call(
        _linear_kernel,
        out_shape=jax.ShapeDtypeStruct((n_tiles, tile_rows), x.dtype),
        grid=(n_tiles,),
        in_specs=[
            pl.BlockSpec((tile_rows, D), lambda i: (i, 0)),      # streamed x slab
            pl.BlockSpec((_SUBLANES, D), lambda i: (0, 0)),      # resident weight
            pl.BlockSpec(memory_space=pltpu.MemorySpace.SMEM),   # bias scalar
        ],
        out_specs=pl.BlockSpec((1, tile_rows), lambda i: (i, 0)),
        compiler_params=pltpu.CompilerParams(
            dimension_semantics=("parallel",),     # shard batch loop across TCs (v7x)
            vmem_limit_bytes=vmem_limit,
        ),
        cost_estimate=pl.CostEstimate(
            flops=2 * B * D,
            transcendentals=0,
            bytes_accessed=B * D * 4 + B * 4 + _SUBLANES * D * 4 + 4,
        ),
    )(x, w8, b)

    return out.reshape(n_tiles * tile_rows)[:B].reshape(B, 1)


if __name__ == "__main__":
    key = jax.random.PRNGKey(0)
    kw, kb, k1, k2, k3, k4 = jax.random.split(key, 6)

    D = _FEATURES
    # Deterministic init mimicking torch.nn.Linear's uniform(-1/sqrt(64), 1/sqrt(64)).
    bound = 1.0 / jnp.sqrt(jnp.float32(D))
    w = jax.random.uniform(kw, (D, 1), minval=-bound, maxval=bound, dtype=jnp.float32)
    b = jax.random.uniform(kb, (1,), minval=-bound, maxval=bound, dtype=jnp.float32)

    # (batch, kwargs): tiny batch -> XLA fallback; others force the Pallas path
    # (exact single tile, ragged B % 128 != 0, and multi-tile + multi-chunk).
    cases = [
        (8,    dict(),                                              k1),
        (1024, dict(min_rows_for_kernel=0),                         k2),
        (300,  dict(min_rows_for_kernel=0),                         k3),
        (2176, dict(min_rows_for_kernel=0, rows_per_tile=2048),     k4),
    ]
    for bsz, kwargs, kk in cases:
        x = jax.random.normal(kk, (bsz, D), dtype=jnp.float32)
        out = belief_model_forward(x, w, b, **kwargs)
        jax.block_until_ready(out)

        ref = jnp.matmul(x, w, precision=jax.lax.Precision.HIGHEST) + b
        assert out.shape == (bsz, 1), out.shape
        err = float(jnp.max(jnp.abs(out - ref)))
        # Loose tolerance: the MXU's default f32 matmul precision may use
        # reduced-precision passes; values here are O(1).
        assert err < 2e-2, err

    print("KERNEL_OK")
</pallas_src>

<mosaic_0001>
module attributes {stable_mosaic.version = 11 : i64} {
  func.func @_linear_kernel(%arg0: i32, %arg1: memref<1024x64xf32, #tpu.memory_space<vmem>>, %arg2: memref<8x64xf32, #tpu.memory_space<vmem>>, %arg3: memref<1xf32, #tpu.memory_space<smem>>, %arg4: memref<1x1024xf32, #tpu.memory_space<vmem>>) attributes {dimension_semantics = [#tpu.dimension_semantics<parallel>], iteration_bounds = array<i64: 1>, scalar_prefetch = 0 : i64, scratch_operands = 0 : i64, tpu.core_type = #tpu.core_type<tc>, window_params = [{transform_indices = @transform_0, window_bounds = array<i64: 1024, 64>}, {pipeline_mode = #tpu.pipeline_mode<synchronous>, transform_indices = @transform_1, window_bounds = array<i64: 8, 64>}, {transform_indices = @transform_2, window_bounds = array<i64: 1>}, {transform_indices = @transform_3, window_bounds = array<i64: 1, 1024>}]} {
    %c0 = arith.constant 0 : index
    %c0_0 = arith.constant 0 : index
    %0 = vector.load %arg2[%c0, %c0_0] : memref<8x64xf32, #tpu.memory_space<vmem>>, vector<8x64xf32>
    %c0_1 = arith.constant 0 : index
    %1 = memref.load %arg3[%c0_1] : memref<1xf32, #tpu.memory_space<smem>>
    %c0_i32 = arith.constant 0 : i32
    %c1024_i32 = arith.constant 1024 : i32
    %2 = arith.muli %c0_i32, %c1024_i32 : i32
    %3 = tpu.assume_multiple %2, 1024 : i32
    %4 = arith.index_cast %3 : i32 to index
    %c0_2 = arith.constant 0 : index
    %5 = vector.load %arg1[%4, %c0_2] : memref<1024x64xf32, #tpu.memory_space<vmem>>, vector<1024x64xf32>
    %cst = arith.constant dense<0.000000e+00> : vector<8x1024xf32>
    %6 = tpu.matmul %0, %5, %cst {dimension_numbers = #tpu.dot_dimension_numbers<[1], [1], [0], [0], [0, 0, 1, 0], [], []>} : vector<8x64xf32>, vector<1024x64xf32>, vector<8x1024xf32> -> vector<8x1024xf32>
    %7 = vector.extract_strided_slice %6 {offsets = [0, 0], sizes = [1, 1024], strides = [1, 1]} : vector<8x1024xf32> to vector<1x1024xf32>
    %8 = vector.broadcast %1 : f32 to vector<1x1024xf32>
    %9 = arith.addf %7, %8 : vector<1x1024xf32>
    %c0_3 = arith.constant 0 : index
    %10 = arith.index_cast %3 : i32 to index
    %11 = vector.load %arg4[%c0_3, %10] : memref<1x1024xf32, #tpu.memory_space<vmem>>, vector<1x1024xf32>
    tpu.vector_store %arg4[%c0_3, %10], %9 {strides = array<i32>} : memref<1x1024xf32, #tpu.memory_space<vmem>>, vector<1x1024xf32>,
    %c1_i32 = arith.constant 1 : i32
    return
  }
  func.func @transform_0(%arg0: i32) -> (i32, i32) {
    %c0_i32 = arith.constant 0 : i32
    %c0_i32_0 = arith.constant 0 : i32
    return %arg0, %c0_i32 : i32, i32
  }
  func.func @transform_1(%arg0: i32) -> (i32, i32) {
    %c0_i32 = arith.constant 0 : i32
    %c0_i32_0 = arith.constant 0 : i32
    %c0_i32_1 = arith.constant 0 : i32
    return %c0_i32, %c0_i32_0 : i32, i32
  }
  func.func @transform_2(%arg0: i32) -> i32 {
    %c0_i32 = arith.constant 0 : i32
    %c0_i32_0 = arith.constant 0 : i32
    return %c0_i32 : i32
  }
  func.func @transform_3(%arg0: i32) -> (i32, i32) {
    %c0_i32 = arith.constant 0 : i32
    %c0_i32_0 = arith.constant 0 : i32
    return %arg0, %c0_i32 : i32, i32
  }
}

</mosaic_0001>

<bundles_post_ra>
// kernel: tpu_custom_call.1
= control target key start
LH: loop header
LB: loop body
LE: loop exit
PB: predicated region body
PF: predicated region fallthrough
CT: control target
= control target key end

     0   :  { %vm146_vm0 = vcmask 523264   ;;  %s1753_s0 = inlined_call_operand.vmem [shape: f32[1024,64], index: 0, kind: input, shape index: {}]   ;;  %s1754_s1 = inlined_call_operand.vmem [shape: f32[8,64], index: 1, kind: input, shape index: {}]   ;;  %s1755_s2 = inlined_call_operand.<no memory space> [shape: f32[1], index: 2, kind: input, shape index: {}]   ;;  %s1756_s3 = inlined_call_operand.hbm [shape: f32[1,1024], index: 3, kind: output, shape index: {}]  }
   0x1   :  { %v49_v0 = vld [vmem:[%s1753_s0 + $0xf8] sm:$0xff]  ;;  %v48_v4 = vld [vmem:[%s1753_s0 + $0xf0] sm:$0xff]  ;;  %v47_v8 = vld [vmem:[%s1753_s0 + $0xe8] sm:$0xff] }
   0x2   :  { %v81_v1 = vld [vmem:[%s1753_s0 + $0x1f8] sm:$0xff]  ;;  %1032 = vmatprep.subr.msk.mxu0 %vm146_vm0, %v49_v0  ;;  %v80_v5 = vld [vmem:[%s1753_s0 + $0x1f0] sm:$0xff]  ;;  %v79_v9 = vld [vmem:[%s1753_s0 + $0x1e8] sm:$0xff] }
   0x3   :  { %v33_v2 = vld [vmem:[%s1753_s0 + $0x78] sm:$0xff]  ;;  %1066 = vmatprep.subr.msk.mxu1 %vm146_vm0, %v81_v1  ;;  %v32_v6 = vld [vmem:[%s1753_s0 + $0x70] sm:$0xff]  ;;  %v31_v10 = vld [vmem:[%s1753_s0 + $0x68] sm:$0xff] }
   0x4   :  { %v65_v3 = vld [vmem:[%s1753_s0 + $0x178] sm:$0xff]  ;;  %1033 = vmatpush3.xpose.msk.msra.mxu0 %vm146_vm0, %v33_v2  ;;  %v64_v7 = vld [vmem:[%s1753_s0 + $0x170] sm:$0xff]  ;;  %v63_v11 = vld [vmem:[%s1753_s0 + $0x168] sm:$0xff] }
   0x5   :  { %1067 = vmatpush3.xpose.msk.msra.mxu1 %vm146_vm0, %v65_v3  ;;  %1034 = vmatprep.subr.msk.mxu0 %vm146_vm0, %v48_v4  ;;  %v46_v12 = vld [vmem:[%s1753_s0 + $0xe0] sm:$0xff]  ;;  %v45_v16 = vld [vmem:[%s1753_s0 + $0xd8] sm:$0xff]  ;;  %v44_v20 = vld [vmem:[%s1753_s0 + $0xd0] sm:$0xff] }
   0x6   :  { %1068 = vmatprep.subr.msk.mxu1 %vm146_vm0, %v80_v5  ;;  %v78_v13 = vld [vmem:[%s1753_s0 + $0x1e0] sm:$0xff]  ;;  %v77_v17 = vld [vmem:[%s1753_s0 + $0x1d8] sm:$0xff]  ;;  %v76_v21 = vld [vmem:[%s1753_s0 + $0x1d0] sm:$0xff] }
   0x7   :  { %v30_v14 = vld [vmem:[%s1753_s0 + $0x60] sm:$0xff]  ;;  %v29_v18 = vld [vmem:[%s1753_s0 + $0x58] sm:$0xff]  ;;  %v28_v22 = vld [vmem:[%s1753_s0 + $0x50] sm:$0xff] }
   0x8   :  { %1035 = vmatpush3.xpose.msk.msra.mxu0 %vm146_vm0, %v32_v6  ;;  %v62_v15 = vld [vmem:[%s1753_s0 + $0x160] sm:$0xff]  ;;  %v61_v19 = vld [vmem:[%s1753_s0 + $0x158] sm:$0xff]  ;;  %v60_v23 = vld [vmem:[%s1753_s0 + $0x150] sm:$0xff] }
   0x9   :  { %1069 = vmatpush3.xpose.msk.msra.mxu1 %vm146_vm0, %v64_v7  ;;  %1036 = vmatprep.subr.msk.mxu0 %vm146_vm0, %v47_v8  ;;  %v43_v24 = vld [vmem:[%s1753_s0 + $0xc8] sm:$0xff]  ;;  %v1317_v26 = vld [vmem:[%s1754_s1] sm:$0xff]  ;;  %v41_v33 = vld [vmem:[%s1753_s0 + $0xb8] sm:$0xff] }
   0xa   :  { %1070 = vmatprep.subr.msk.mxu1 %vm146_vm0, %v79_v9  ;;  %v75_v25 = vld [vmem:[%s1753_s0 + $0x1c8] sm:$0xff]  ;;  %v42_v29 = vld [vmem:[%s1753_s0 + $0xc0] sm:$0xff]  ;;  %1064 = vmatprep.mubr.msk.f32.mxu0 %vm146_vm0, %v1317_v26  ;;  %v73_v34 = vld [vmem:[%s1753_s0 + $0x1b8] sm:$0xff] }
   0xb   :  { %v27_v27 = vld [vmem:[%s1753_s0 + $0x48] sm:$0xff]  ;;  %v74_v30 = vld [vmem:[%s1753_s0 + $0x1c0] sm:$0xff]  ;;  %1098 = vmatprep.mubr.msk.f32.mxu1 %vm146_vm0, %v1317_v26  ;;  %v25_v35 = vld [vmem:[%s1753_s0 + $0x38] sm:$0xff] }
   0xc   :  { %1037 = vmatpush3.xpose.msk.msra.mxu0 %vm146_vm0, %v31_v10  ;;  %v59_v28 = vld [vmem:[%s1753_s0 + $0x148] sm:$0xff]  ;;  %v26_v31 = vld [vmem:[%s1753_s0 + $0x40] sm:$0xff]  ;;  %v57_v36 = vld [vmem:[%s1753_s0 + $0x138] sm:$0xff] }
   0xd   :  { %1071 = vmatpush3.xpose.msk.msra.mxu1 %vm146_vm0, %v63_v11  ;;  %1038 = vmatprep.subr.msk.mxu0 %vm146_vm0, %v46_v12  ;;  %v58_v32 = vld [vmem:[%s1753_s0 + $0x140] sm:$0xff]  ;;  %v40_v37 = vld [vmem:[%s1753_s0 + $0xb0] sm:$0xff]  ;;  %v39_v41 = vld [vmem:[%s1753_s0 + $0xa8] sm:$0xff] }
   0xe   :  { %1072 = vmatprep.subr.msk.mxu1 %vm146_vm0, %v78_v13  ;;  %v72_v38 = vld [vmem:[%s1753_s0 + $0x1b0] sm:$0xff]  ;;  %v71_v42 = vld [vmem:[%s1753_s0 + $0x1a8] sm:$0xff]  ;;  %v38_v45 = vld [vmem:[%s1753_s0 + $0xa0] sm:$0xff] }
   0xf   :  { %v24_v39 = vld [vmem:[%s1753_s0 + $0x30] sm:$0xff]  ;;  %v23_v43 = vld [vmem:[%s1753_s0 + $0x28] sm:$0xff]  ;;  %v70_v46 = vld [vmem:[%s1753_s0 + $0x1a0] sm:$0xff] }
  0x10   :  { %1039 = vmatpush3.xpose.msk.msra.mxu0 %vm146_vm0, %v30_v14  ;;  %v56_v40 = vld [vmem:[%s1753_s0 + $0x130] sm:$0xff]  ;;  %v55_v44 = vld [vmem:[%s1753_s0 + $0x128] sm:$0xff]  ;;  %v22_v47 = vld [vmem:[%s1753_s0 + $0x20] sm:$0xff] }
  0x11   :  { %1073 = vmatpush3.xpose.msk.msra.mxu1 %vm146_vm0, %v62_v15  ;;  %1040 = vmatprep.subr.msk.mxu0 %vm146_vm0, %v45_v16  ;;  %v54_v48 = vld [vmem:[%s1753_s0 + $0x120] sm:$0xff] }
  0x12   :  { %1074 = vmatprep.subr.msk.mxu1 %vm146_vm0, %v77_v17 }
  0x14   :  { %1041 = vmatpush3.xpose.msk.msra.mxu0 %vm146_vm0, %v29_v18 }
  0x15   :  { %1075 = vmatpush3.xpose.msk.msra.mxu1 %vm146_vm0, %v61_v19  ;;  %1042 = vmatprep.subr.msk.mxu0 %vm146_vm0, %v44_v20 }
  0x16   :  { %1076 = vmatprep.subr.msk.mxu1 %vm146_vm0, %v76_v21 }
  0x18   :  { %1043 = vmatpush3.xpose.msk.msra.mxu0 %vm146_vm0, %v28_v22 }
  0x19   :  { %1077 = vmatpush3.xpose.msk.msra.mxu1 %vm146_vm0, %v60_v23  ;;  %1044 = vmatprep.subr.msk.mxu0 %vm146_vm0, %v43_v24 }
  0x1a   :  { %1078 = vmatprep.subr.msk.mxu1 %vm146_vm0, %v75_v25 }
  0x1c   :  { %1045 = vmatpush3.xpose.msk.msra.mxu0 %vm146_vm0, %v27_v27 }
  0x1d   :  { %1079 = vmatpush3.xpose.msk.msra.mxu1 %vm146_vm0, %v59_v28  ;;  %1046 = vmatprep.subr.msk.mxu0 %vm146_vm0, %v42_v29 }
  0x1e   :  { %1080 = vmatprep.subr.msk.mxu1 %vm146_vm0, %v74_v30 }
  0x20   :  { %1047 = vmatpush3.xpose.msk.msra.mxu0 %vm146_vm0, %v26_v31 }
  0x21   :  { %1081 = vmatpush3.xpose.msk.msra.mxu1 %vm146_vm0, %v58_v32  ;;  %1048 = vmatprep.subr.msk.mxu0 %vm146_vm0, %v41_v33 }
  0x22   :  { %1082 = vmatprep.subr.msk.mxu1 %vm146_vm0, %v73_v34 }
  0x24   :  { %1049 = vmatpush3.xpose.msk.msra.mxu0 %vm146_vm0, %v25_v35 }
  0x25   :  { %1083 = vmatpush3.xpose.msk.msra.mxu1 %vm146_vm0, %v57_v36  ;;  %1050 = vmatprep.subr.msk.mxu0 %vm146_vm0, %v40_v37 }
  0x26   :  { %1084 = vmatprep.subr.msk.mxu1 %vm146_vm0, %v72_v38 }
  0x28   :  { %1051 = vmatpush3.xpose.msk.msra.mxu0 %vm146_vm0, %v24_v39 }
  0x29   :  { %1085 = vmatpush3.xpose.msk.msra.mxu1 %vm146_vm0, %v56_v40  ;;  %1052 = vmatprep.subr.msk.mxu0 %vm146_vm0, %v39_v41 }
  0x2a   :  { %1086 = vmatprep.subr.msk.mxu1 %vm146_vm0, %v71_v42 }
  0x2c   :  { %1053 = vmatpush3.xpose.msk.msra.mxu0 %vm146_vm0, %v23_v43 }
  0x2d   :  { %1087 = vmatpush3.xpose.msk.msra.mxu1 %vm146_vm0, %v55_v44  ;;  %1054 = vmatprep.subr.msk.mxu0 %vm146_vm0, %v38_v45 }
  0x2e   :  { %1088 = vmatprep.subr.msk.mxu1 %vm146_vm0, %v70_v46 }
  0x2f   :  { %9 = vsyncpa [#allocation4], 0  ;;  %v37_v49 = vld [vmem:[%s1753_s0 + $0x98] sm:$0xff]  ;;  %v36_v53 = vld [vmem:[%s1753_s0 + $0x90] sm:$0xff] }
  0x30   :  { %v69_v50 = vld [vmem:[%s1753_s0 + $0x198] sm:$0xff]  ;;  %1055 = vmatpush3.xpose.msk.msra.mxu0 %vm146_vm0, %v22_v47  ;;  %v68_v54 = vld [vmem:[%s1753_s0 + $0x190] sm:$0xff]  ;;  %v35_v57 = vld [vmem:[%s1753_s0 + $0x88] sm:$0xff] }
  0x31   :  { %1089 = vmatpush3.xpose.msk.msra.mxu1 %vm146_vm0, %v54_v48  ;;  %1056 = vmatprep.subr.msk.mxu0 %vm146_vm0, %v37_v49  ;;  %v21_v51 = vld [vmem:[%s1753_s0 + $0x18] sm:$0xff]  ;;  %v20_v55 = vld [vmem:[%s1753_s0 + $0x10] sm:$0xff]  ;;  %v67_v58 = vld [vmem:[%s1753_s0 + $0x188] sm:$0xff] }
  0x32   :  { %1090 = vmatprep.subr.msk.mxu1 %vm146_vm0, %v69_v50  ;;  %v53_v52 = vld [vmem:[%s1753_s0 + $0x118] sm:$0xff]  ;;  %v52_v56 = vld [vmem:[%s1753_s0 + $0x110] sm:$0xff]  ;;  %v19_v59 = vld [vmem:[%s1753_s0 + $0x8] sm:$0xff] }
  0x33   :  { %v51_v60 = vld [vmem:[%s1753_s0 + $0x108] sm:$0xff]  ;;  %v34_v61 = vld [vmem:[%s1753_s0 + $0x80] sm:$0xff]  ;;  %v113_v1 = vld [vmem:[%s1753_s0 + $0x2f8] sm:$0xff] }
  0x34   :  { %1057 = vmatpush3.xpose.msk.msra.mxu0 %vm146_vm0, %v21_v51  ;;  %v66_v62 = vld [vmem:[%s1753_s0 + $0x180] sm:$0xff]  ;;  %v145_v2 = vld [vmem:[%s1753_s0 + $0x3f8] sm:$0xff]  ;;  %v112_v5 = vld [vmem:[%s1753_s0 + $0x2f0] sm:$0xff] }
  0x35   :  { %1091 = vmatpush3.xpose.msk.msra.mxu1 %vm146_vm0, %v53_v52  ;;  %1058 = vmatprep.subr.msk.mxu0 %vm146_vm0, %v36_v53  ;;  %v18_v63 = vld [vmem:[%s1753_s0] sm:$0xff]  ;;  %v97_v3 = vld [vmem:[%s1753_s0 + $0x278] sm:$0xff]  ;;  %v144_v6 = vld [vmem:[%s1753_s0 + $0x3f0] sm:$0xff] }
  0x36   :  { %1092 = vmatprep.subr.msk.mxu1 %vm146_vm0, %v68_v54  ;;  %v50_v0 = vld [vmem:[%s1753_s0 + $0x100] sm:$0xff]  ;;  %v129_v4 = vld [vmem:[%s1753_s0 + $0x378] sm:$0xff]  ;;  %v96_v7 = vld [vmem:[%s1753_s0 + $0x270] sm:$0xff] }
  0x37   :  { %v128_v8 = vld [vmem:[%s1753_s0 + $0x370] sm:$0xff]  ;;  %v111_v9 = vld [vmem:[%s1753_s0 + $0x2e8] sm:$0xff]  ;;  %v110_v13 = vld [vmem:[%s1753_s0 + $0x2e0] sm:$0xff] }
  0x38   :  { %1059 = vmatpush3.xpose.msk.msra.mxu0 %vm146_vm0, %v20_v55  ;;  %v143_v10 = vld [vmem:[%s1753_s0 + $0x3e8] sm:$0xff]  ;;  %v142_v14 = vld [vmem:[%s1753_s0 + $0x3e0] sm:$0xff]  ;;  %v109_v17 = vld [vmem:[%s1753_s0 + $0x2d8] sm:$0xff] }
  0x39   :  { %1093 = vmatpush3.xpose.msk.msra.mxu1 %vm146_vm0, %v52_v56  ;;  %1060 = vmatprep.subr.msk.mxu0 %vm146_vm0, %v35_v57  ;;  %v95_v11 = vld [vmem:[%s1753_s0 + $0x268] sm:$0xff]  ;;  %v94_v15 = vld [vmem:[%s1753_s0 + $0x260] sm:$0xff]  ;;  %v141_v18 = vld [vmem:[%s1753_s0 + $0x3d8] sm:$0xff] }
  0x3a   :  { %1094 = vmatprep.subr.msk.mxu1 %vm146_vm0, %v67_v58  ;;  %v127_v12 = vld [vmem:[%s1753_s0 + $0x368] sm:$0xff]  ;;  %v126_v16 = vld [vmem:[%s1753_s0 + $0x360] sm:$0xff]  ;;  %v93_v19 = vld [vmem:[%s1753_s0 + $0x258] sm:$0xff] }
  0x3b   :  { %v125_v20 = vld [vmem:[%s1753_s0 + $0x358] sm:$0xff]  ;;  %v108_v21 = vld [vmem:[%s1753_s0 + $0x2d0] sm:$0xff]  ;;  %v107_v25 = vld [vmem:[%s1753_s0 + $0x2c8] sm:$0xff] }
  0x3c   :  { %1061 = vmatpush3.xpose.msk.msra.mxu0 %vm146_vm0, %v19_v59  ;;  %v140_v22 = vld [vmem:[%s1753_s0 + $0x3d0] sm:$0xff]  ;;  %v139_v27 = vld [vmem:[%s1753_s0 + $0x3c8] sm:$0xff]  ;;  %v106_v30 = vld [vmem:[%s1753_s0 + $0x2c0] sm:$0xff] }
  0x3d   :  { %1095 = vmatpush3.xpose.msk.msra.mxu1 %vm146_vm0, %v51_v60  ;;  %1062 = vmatprep.subr.msk.mxu0 %vm146_vm0, %v34_v61  ;;  %v92_v23 = vld [vmem:[%s1753_s0 + $0x250] sm:$0xff]  ;;  %v91_v28 = vld [vmem:[%s1753_s0 + $0x248] sm:$0xff]  ;;  %v138_v31 = vld [vmem:[%s1753_s0 + $0x3c0] sm:$0xff] }
  0x3e   :  { %1096 = vmatprep.subr.msk.mxu1 %vm146_vm0, %v66_v62  ;;  %v124_v24 = vld [vmem:[%s1753_s0 + $0x350] sm:$0xff]  ;;  %v123_v29 = vld [vmem:[%s1753_s0 + $0x348] sm:$0xff]  ;;  %v90_v32 = vld [vmem:[%s1753_s0 + $0x240] sm:$0xff] }
  0x3f   :  { %v122_v33 = vld [vmem:[%s1753_s0 + $0x340] sm:$0xff]  ;;  %v105_v34 = vld [vmem:[%s1753_s0 + $0x2b8] sm:$0xff]  ;;  %v104_v38 = vld [vmem:[%s1753_s0 + $0x2b0] sm:$0xff] }
  0x40   :  { %1063 = vmatpush3.xpose.msk.msra.mxu0 %vm146_vm0, %v18_v63  ;;  %v137_v35 = vld [vmem:[%s1753_s0 + $0x3b8] sm:$0xff]  ;;  %v136_v39 = vld [vmem:[%s1753_s0 + $0x3b0] sm:$0xff]  ;;  %v103_v42 = vld [vmem:[%s1753_s0 + $0x2a8] sm:$0xff] }
  0x41   :  { %1097 = vmatpush3.xpose.msk.msra.mxu1 %vm146_vm0, %v50_v0  ;;  %1100 = vmatprep.subr.msk.mxu0 %vm146_vm0, %v113_v1  ;;  %v89_v36 = vld [vmem:[%s1753_s0 + $0x238] sm:$0xff]  ;;  %v88_v40 = vld [vmem:[%s1753_s0 + $0x230] sm:$0xff]  ;;  %v135_v43 = vld [vmem:[%s1753_s0 + $0x3a8] sm:$0xff] }
  0x42   :  { %1134 = vmatprep.subr.msk.mxu1 %vm146_vm0, %v145_v2  ;;  %v121_v37 = vld [vmem:[%s1753_s0 + $0x338] sm:$0xff]  ;;  %v120_v41 = vld [vmem:[%s1753_s0 + $0x330] sm:$0xff]  ;;  %v87_v44 = vld [vmem:[%s1753_s0 + $0x228] sm:$0xff] }
  0x43   :  { %1065 = vmatmul.mubr.msk.f32.vlgmr.msra.gmra.mxu0 %vm146_vm0, %v1317_v26  ;;  %v119_v45 = vld [vmem:[%s1753_s0 + $0x328] sm:$0xff]  ;;  %v102_v46 = vld [vmem:[%s1753_s0 + $0x2a0] sm:$0xff]  ;;  %v101_v50 = vld [vmem:[%s1753_s0 + $0x298] sm:$0xff] }
  0x44   :  { %1099 = vmatmul.mubr.msk.f32.vlgmr.msra.gmra.mxu1 %vm146_vm0, %v1317_v26  ;;  %1101 = vmatpush3.xpose.msk.msra.mxu0 %vm146_vm0, %v97_v3  ;;  %v134_v47 = vld [vmem:[%s1753_s0 + $0x3a0] sm:$0xff]  ;;  %v133_v51 = vld [vmem:[%s1753_s0 + $0x398] sm:$0xff]  ;;  %v100_v54 = vld [vmem:[%s1753_s0 + $0x290] sm:$0xff] }
  0x45   :  { %1135 = vmatpush3.xpose.msk.msra.mxu1 %vm146_vm0, %v129_v4  ;;  %1102 = vmatprep.subr.msk.mxu0 %vm146_vm0, %v112_v5  ;;  %v86_v48 = vld [vmem:[%s1753_s0 + $0x220] sm:$0xff]  ;;  %v85_v52 = vld [vmem:[%s1753_s0 + $0x218] sm:$0xff]  ;;  %v132_v55 = vld [vmem:[%s1753_s0 + $0x390] sm:$0xff]  ;;  %v1192_v4 = vmov 1966171168  }
  0x46   :  { %1136 = vmatprep.subr.msk.mxu1 %vm146_vm0, %v144_v6  ;;  %1132 = vmatprep.mubr.msk.f32.mxu0 %vm146_vm0, %v1317_v26  ;;  %v118_v49 = vld [vmem:[%s1753_s0 + $0x320] sm:$0xff]  ;;  %v117_v53 = vld [vmem:[%s1753_s0 + $0x318] sm:$0xff]  ;;  %v84_v56 = vld [vmem:[%s1753_s0 + $0x210] sm:$0xff]  ;;  %v840_v5 = vunpack.c.l.s4 %v1192_v4  ;;  %v842_v6 = vlaneseq }
  0x47   :  { %1166 = vmatprep.mubr.msk.f32.mxu1 %vm146_vm0, %v1317_v26  ;;  %v116_v57 = vld [vmem:[%s1753_s0 + $0x310] sm:$0xff]  ;;  %v99_v58 = vld [vmem:[%s1753_s0 + $0x288] sm:$0xff]  ;;  %v98_v62 = vld [vmem:[%s1753_s0 + $0x280] sm:$0xff] }
  0x48   :  { %1103 = vmatpush3.xpose.msk.msra.mxu0 %vm146_vm0, %v96_v7  ;;  %v131_v59 = vld [vmem:[%s1753_s0 + $0x388] sm:$0xff]  ;;  %v130_v63 = vld [vmem:[%s1753_s0 + $0x380] sm:$0xff]  ;;  %v818_v7 = vstv %s1755_s2 }
  0x49   :  { %1137 = vmatpush3.xpose.msk.msra.mxu1 %vm146_vm0, %v128_v8  ;;  %1104 = vmatprep.subr.msk.mxu0 %vm146_vm0, %v111_v9  ;;  %v83_v60 = vld [vmem:[%s1753_s0 + $0x208] sm:$0xff]  ;;  %v82_v0 = vld [vmem:[%s1753_s0 + $0x200] sm:$0xff] }
  0x4a   :  { %1138 = vmatprep.subr.msk.mxu1 %vm146_vm0, %v143_v10  ;;  %v115_v61 = vld [vmem:[%s1753_s0 + $0x308] sm:$0xff]  ;;  %v114_v1 = vld [vmem:[%s1753_s0 + $0x300] sm:$0xff]  ;;  %v841_v10 = vunpack.c.0.s8 %v840_v5  ;;  %s1193_s0 = smov [#allocation3]  }
  0x4b   :  { %s892_s2 = sshll.u32 %s1193_s0, 4  ;;  %s893_s2 = int_to_ptr.vmem [resolvable:$true] %s892_s2 }
  0x4c   :  { %1105 = vmatpush3.xpose.msk.msra.mxu0 %vm146_vm0, %v95_v11  ;;  %v843_v11 = vshrl.u32 %v842_v6, 7  ;;  %s1170_s21 = scalar_lea.vmem %s893_s2, 128  ;;  %p1175_p1 = scmp.lt.s32.totalorder %s893_s2, %s893_s2 }
  0x4d   :  { %1139 = vmatpush3.xpose.msk.msra.mxu1 %vm146_vm0, %v127_v12  ;;  %1106 = vmatprep.subr.msk.mxu0 %vm146_vm0, %v110_v13  ;;  %p1171_p0 = scmp.ne.s32.totalorder %s893_s2, %s1170_s21  ;;  %p1176_p2 = scmp.lt.s32.totalorder %s1170_s21, %s1170_s21 }
  0x4e   :  { %1140 = vmatprep.subr.msk.mxu1 %vm146_vm0, %v142_v14 }
  0x4f   :  { %p1177_p3 = por %p1176_p2, %p1175_p1 }
  0x50   :  { %1107 = vmatpush3.xpose.msk.msra.mxu0 %vm146_vm0, %v94_v15 }
  0x51   :  { %1141 = vmatpush3.xpose.msk.msra.mxu1 %vm146_vm0, %v126_v16  ;;  %1108 = vmatprep.subr.msk.mxu0 %vm146_vm0, %v109_v17  ;;  %v844_v17 = vsub.s32 %v841_v10, %v843_v11  ;;  %p1178_p4 = pnand %p1177_p3, %p1171_p0 }
  0x52   :  { %1142 = vmatprep.subr.msk.mxu1 %vm146_vm0, %v141_v18 }
  0x54   :  { %1109 = vmatpush3.xpose.msk.msra.mxu0 %vm146_vm0, %v93_v19 }
  0x55   :  { %1143 = vmatpush3.xpose.msk.msra.mxu1 %vm146_vm0, %v125_v20  ;;  %1110 = vmatprep.subr.msk.mxu0 %vm146_vm0, %v108_v21 }
  0x56   :  { %1144 = vmatprep.subr.msk.mxu1 %vm146_vm0, %v140_v22 }
  0x58   :  { %1111 = vmatpush3.xpose.msk.msra.mxu0 %vm146_vm0, %v92_v23 }
  0x59   :  { %1145 = vmatpush3.xpose.msk.msra.mxu1 %vm146_vm0, %v124_v24  ;;  %1112 = vmatprep.subr.msk.mxu0 %vm146_vm0, %v107_v25 }
  0x5a   :  { %1146 = vmatprep.subr.msk.mxu1 %vm146_vm0, %v139_v27 }
  0x5c   :  { %1113 = vmatpush3.xpose.msk.msra.mxu0 %vm146_vm0, %v91_v28 }
  0x5d   :  { %1147 = vmatpush3.xpose.msk.msra.mxu1 %vm146_vm0, %v123_v29  ;;  %1114 = vmatprep.subr.msk.mxu0 %vm146_vm0, %v106_v30 }
  0x5e   :  { %1148 = vmatprep.subr.msk.mxu1 %vm146_vm0, %v138_v31 }
  0x60   :  { %1115 = vmatpush3.xpose.msk.msra.mxu0 %vm146_vm0, %v90_v32 }
  0x61   :  { %1149 = vmatpush3.xpose.msk.msra.mxu1 %vm146_vm0, %v122_v33  ;;  %1116 = vmatprep.subr.msk.mxu0 %vm146_vm0, %v105_v34 }
  0x62   :  { %1150 = vmatprep.subr.msk.mxu1 %vm146_vm0, %v137_v35 }
  0x64   :  { %1117 = vmatpush3.xpose.msk.msra.mxu0 %vm146_vm0, %v89_v36 }
  0x65   :  { %1151 = vmatpush3.xpose.msk.msra.mxu1 %vm146_vm0, %v121_v37  ;;  %1118 = vmatprep.subr.msk.mxu0 %vm146_vm0, %v104_v38 }
  0x66   :  { %1152 = vmatprep.subr.msk.mxu1 %vm146_vm0, %v136_v39 }
  0x68   :  { %1119 = vmatpush3.xpose.msk.msra.mxu0 %vm146_vm0, %v88_v40 }
  0x69   :  { %1153 = vmatpush3.xpose.msk.msra.mxu1 %vm146_vm0, %v120_v41  ;;  %1120 = vmatprep.subr.msk.mxu0 %vm146_vm0, %v103_v42 }
  0x6a   :  { %1154 = vmatprep.subr.msk.mxu1 %vm146_vm0, %v135_v43 }
  0x6c   :  { %1121 = vmatpush3.xpose.msk.msra.mxu0 %vm146_vm0, %v87_v44 }
  0x6d   :  { %1155 = vmatpush3.xpose.msk.msra.mxu1 %vm146_vm0, %v119_v45  ;;  %1122 = vmatprep.subr.msk.mxu0 %vm146_vm0, %v102_v46 }
  0x6e   :  { %1156 = vmatprep.subr.msk.mxu1 %vm146_vm0, %v134_v47 }
  0x70   :  { %1123 = vmatpush3.xpose.msk.msra.mxu0 %vm146_vm0, %v86_v48 }
  0x71   :  { %1157 = vmatpush3.xpose.msk.msra.mxu1 %vm146_vm0, %v118_v49  ;;  %1124 = vmatprep.subr.msk.mxu0 %vm146_vm0, %v101_v50 }
  0x72   :  { %1158 = vmatprep.subr.msk.mxu1 %vm146_vm0, %v133_v51 }
  0x74   :  { %1125 = vmatpush3.xpose.msk.msra.mxu0 %vm146_vm0, %v85_v52 }
  0x75   :  { %1159 = vmatpush3.xpose.msk.msra.mxu1 %vm146_vm0, %v117_v53  ;;  %1126 = vmatprep.subr.msk.mxu0 %vm146_vm0, %v100_v54 }
  0x76   :  { %1160 = vmatprep.subr.msk.mxu1 %vm146_vm0, %v132_v55 }
  0x78   :  { %1127 = vmatpush3.xpose.msk.msra.mxu0 %vm146_vm0, %v84_v56 }
  0x79   :  { %1161 = vmatpush3.xpose.msk.msra.mxu1 %vm146_vm0, %v116_v57  ;;  %1128 = vmatprep.subr.msk.mxu0 %vm146_vm0, %v99_v58 }
  0x7a   :  { %1162 = vmatprep.subr.msk.mxu1 %vm146_vm0, %v131_v59 }
  0x7c   :  { %1129 = vmatpush3.xpose.msk.msra.mxu0 %vm146_vm0, %v83_v60 }
  0x7d   :  { %1163 = vmatpush3.xpose.msk.msra.mxu1 %vm146_vm0, %v115_v61  ;;  %1130 = vmatprep.subr.msk.mxu0 %vm146_vm0, %v98_v62 }
  0x7e   :  { %1164 = vmatprep.subr.msk.mxu1 %vm146_vm0, %v130_v63 }
  0x80   :  { %1131 = vmatpush3.xpose.msk.msra.mxu0 %vm146_vm0, %v82_v0 }
  0x81   :  { %1165 = vmatpush3.xpose.msk.msra.mxu1 %vm146_vm0, %v114_v1 }
  0x83   :  { %1133 = vmatmul.mubr.msk.f32.vlgmr.msra.gmra.mxu0 %vm146_vm0, %v1317_v26 }
  0x84   :  { %1167 = vmatmul.mubr.msk.f32.vlgmr.msra.gmra.mxu1 %vm146_vm0, %v1317_v26 }
 0x103   :  { %v600_v2 = vpop.f32.mrf.mxu0 }
 0x104   :  { %v671_v3 = vpop.f32.mrf.mxu1  ;;  %v819_v12 = vadd.f32 %v818_v7, %v600_v2 }
 0x105   :  { %v602_v8 = vpop.f32.mrf.mxu0  ;;  %v821_v13 = vadd.f32 %v818_v7, %v671_v3 }
 0x106   :  { %v673_v9 = vpop.f32.mrf.mxu1  ;;  %v820_v14 = vadd.f32 %v818_v7, %v602_v8 }
 0x107   :  { %v822_v15 = vadd.f32 %v818_v7, %v673_v9 }
 0x108   :  { %v835_v16 = vcombine.low %v819_v12, %v820_v14 }
 0x109   :  { %v836_v26 = vcombine.low %v821_v13, %v822_v15 }
 0x10a   :  { %v845_v20 = vrot.slane %v835_v16, %v844_v17 }
 0x10b   :  { %v852_v21 = vrot.slane %v836_v26, %v844_v17 }
 0x10d   :  { %v867_v33 = vcombine.low %v845_v20, %v852_v21 }
 0x10f   :  { %v875_v35 = vrot.slane %v867_v33, %v844_v17 }
 0x143   :  { %v742_v18 = vpop.f32.mrf.mxu0 }
 0x144   :  { %v813_v19 = vpop.f32.mrf.mxu1  ;;  %v823_v24 = vadd.f32 %v818_v7, %v742_v18 }
 0x145   :  { %v744_v22 = vpop.f32.mrf.mxu0  ;;  %v825_v25 = vadd.f32 %v818_v7, %v813_v19 }
 0x146   :  { %v815_v23 = vpop.f32.mrf.mxu1  ;;  %v824_v27 = vadd.f32 %v818_v7, %v744_v22 }
 0x147   :  { %v826_v28 = vadd.f32 %v818_v7, %v815_v23 }
 0x148   :  { %v837_v29 = vcombine.low %v823_v24, %v824_v27 }
 0x149   :  { %v838_v30 = vcombine.low %v825_v25, %v826_v28 }
 0x14a   :  { %v859_v31 = vrot.slane %v837_v29, %v844_v17 }
 0x14b   :  { %v866_v32 = vrot.slane %v838_v30, %v844_v17 }
 0x14d   :  { %v868_v34 = vcombine.low %v859_v31, %v866_v32 }
 0x14f   :  { %v882_v36 = vrot.slane %v868_v34, %v844_v17 }
 0x151   :  { %v883_v37 = vcombine.low %v875_v35, %v882_v36 }
 0x153   :  { %885 = vst [vmem:[#allocation3] sm:$0xff] %v883_v37 }
 0x154   :  { %1181 = shalt.err (!%p1178_p4)
}
 0x155   :  { %895 = dma.vmem_to_hbm [thread:$0]  %s893_s2, 128, %s1756_s3, [#allocation4]  }
 0x156   :  { %1190 = dma.done.wait [#allocation4], 128  }
 0x157   :  { %1191 = vsyncadd [#allocation4], 4294967168 }
 0x158   :  { %899 = vsyncpa [#allocation4], 1 }

</bundles_post_ra>
